<compile_context>
chip_gen: v7x
topology: tpu7x:2x2x1
jax: 0.10.0
libtpu: 0.0.40
codegen_flags: <defaults>
</compile_context>

<pallas_src>
import functools
import math

import jax
import jax.numpy as jnp
from jax.experimental import pallas as pl
from jax.experimental.pallas import tpu as pltpu


# ---------------------------------------------------------------------------
# Fused kernel: one (batch, q-tile) per grid step
# ---------------------------------------------------------------------------
def _decoder_block_kernel(q_ref, k_ref, v_ref, m_ref,
                          wq_ref, wk_ref, wv_ref, wo_ref,
                          bo_ref, g_ref, b_ref, o_ref, *,
                          heads, scale, eps, matmul_dtype):
    q = q_ref[0]                      # (Tq, E) fp32
    k = k_ref[0]                      # (Lk, E) fp32
    v = v_ref[0]                      # (Lk, E) fp32
    m = m_ref[0]                      # (Tq, Lk) int32, 0 = masked

    E = q.shape[-1]
    D = E // heads
    md = matmul_dtype

    # Per-head q/k/v projections as single lane-dense (T, E) x (E, E) matmuls
    # against block-diagonal weights (pre-transposed in the wrapper).
    # 1/sqrt(E) is folded into the (much smaller) q projection result.
    qp = jnp.dot(q.astype(md), wq_ref[...],
                 preferred_element_type=jnp.float32) * scale
    kp = jnp.dot(k.astype(md), wk_ref[...],
                 preferred_element_type=jnp.float32)
    vp = jnp.dot(v.astype(md), wv_ref[...],
                 preferred_element_type=jnp.float32)

    masked = (m == 0)
    neg = jnp.float32(-1e20)

    # NOTE: for very long Lk this should become a flash-style online-softmax
    # loop over Lk tiles; at these sizes the full (Tq, Lk) energy fits VMEM.
    head_outs = []
    for h in range(heads):            # static unroll; heads is small
        sl = slice(h * D, (h + 1) * D)
        qh = qp[:, sl]
        kh = kp[:, sl]
        vh = vp[:, sl]
        # energy = "qd,kd->qk": contract on last dims, no in-kernel transpose
        energy = jax.lax.dot_general(
            qh.astype(md), kh.astype(md),
            dimension_numbers=(((1,), (1,)), ((), ())),
            preferred_element_type=jnp.float32)
        energy = jnp.where(masked, neg, energy)
        # numerically stable softmax over the key axis (fp32)
        energy = energy - jnp.max(energy, axis=-1, keepdims=True)
        p = jnp.exp(energy)
        p = p * pl.reciprocal(jnp.sum(p, axis=-1, keepdims=True))
        head_outs.append(
            jnp.dot(p.astype(md), vh.astype(md),
                    preferred_element_type=jnp.float32))

    att = jnp.concatenate(head_outs, axis=-1)        # (Tq, E), lane dense

    # fc_out (weight pre-transposed) + bias, residual, LayerNorm (all fp32)
    x = jnp.dot(att.astype(md), wo_ref[...],
                preferred_element_type=jnp.float32) + bo_ref[...]
    y = q + x                                        # residual: query + attn
    mu = jnp.mean(y, axis=-1, keepdims=True)
    var = jnp.mean((y - mu) ** 2, axis=-1, keepdims=True)
    out = (y - mu) * jax.lax.rsqrt(var + eps) * g_ref[...] + b_ref[...]

    # dropout: identity at inference time
    o_ref[0] = out.astype(o_ref.dtype)


# ---------------------------------------------------------------------------
# Wrapper
# ---------------------------------------------------------------------------
def decoder_block1(key, query, values, mask, params, *, embed_size, heads,
                   block_q=128, matmul_dtype=jnp.float32):
    """key/query/values: (N, L, E) float32; mask: (N, Lq, Lk), 0 = masked.

    Set matmul_dtype=jnp.bfloat16 on v6e/v7x for bf16 MXU operands (softmax /
    LayerNorm stay fp32); default fp32 matches the PyTorch module bit-for-bit
    semantics.
    """
    N, Lq, E = query.shape
    Lk = key.shape[1]
    assert values.shape[1] == Lk, "key/value lengths must match"
    assert E == embed_size and E % heads == 0

    block_q = min(block_q, Lq)
    grid = (N, pl.cdiv(Lq, block_q))

    # Block-diagonal, pre-transposed per-head projection weights: one
    # lane-dense (E, E) operand replaces H tiny (D, D) matmuls + in-kernel .T
    eye = jnp.eye(heads, dtype=jnp.float32)
    wq_bd = jnp.kron(eye, params["w_q"].T).astype(matmul_dtype)
    wk_bd = jnp.kron(eye, params["w_k"].T).astype(matmul_dtype)
    wv_bd = jnp.kron(eye, params["w_v"].T).astype(matmul_dtype)
    wo_t = params["w_o"].T.astype(matmul_dtype)
    mask_i = mask.astype(jnp.int32)

    kernel = functools.partial(
        _decoder_block_kernel,
        heads=heads, scale=1.0 / math.sqrt(embed_size), eps=1e-5,
        matmul_dtype=matmul_dtype)

    return pl.pallas_call(
        kernel,
        out_shape=jax.ShapeDtypeStruct((N, Lq, E), query.dtype),
        grid=grid,
        in_specs=[
            pl.BlockSpec((1, block_q, E), lambda n, i: (n, i, 0)),   # query
            pl.BlockSpec((1, Lk, E), lambda n, i: (n, 0, 0)),        # key
            pl.BlockSpec((1, Lk, E), lambda n, i: (n, 0, 0)),        # values
            pl.BlockSpec((1, block_q, Lk), lambda n, i: (n, i, 0)),  # mask
            pl.BlockSpec((E, E), lambda n, i: (0, 0)),               # wq (bd)
            pl.BlockSpec((E, E), lambda n, i: (0, 0)),               # wk (bd)
            pl.BlockSpec((E, E), lambda n, i: (0, 0)),               # wv (bd)
            pl.BlockSpec((E, E), lambda n, i: (0, 0)),               # wo.T
            pl.BlockSpec((1, E), lambda n, i: (0, 0)),               # b_o
            pl.BlockSpec((1, E), lambda n, i: (0, 0)),               # gamma
            pl.BlockSpec((1, E), lambda n, i: (0, 0)),               # beta
        ],
        out_specs=pl.BlockSpec((1, block_q, E), lambda n, i: (n, i, 0)),
        compiler_params=pltpu.CompilerParams(
            dimension_semantics=("parallel", "parallel")),
    )(query, key, values, mask_i, wq_bd, wk_bd, wv_bd, wo_t,
      params["b_o"], params["ln_gamma"], params["ln_beta"])


def init_params(rng, embed_size, heads):
    D = embed_size // heads
    k1, k2, k3, k4 = jax.random.split(rng, 4)
    scale = 0.02
    return {
        # nn.Linear(head_dim, head_dim, bias=False) x3, shared across heads
        "w_q": scale * jax.random.normal(k1, (D, D), jnp.float32),
        "w_k": scale * jax.random.normal(k2, (D, D), jnp.float32),
        "w_v": scale * jax.random.normal(k3, (D, D), jnp.float32),
        # fc_out = nn.Linear(embed_size, embed_size)
        "w_o": scale * jax.random.normal(k4, (embed_size, embed_size),
                                         jnp.float32),
        "b_o": jnp.zeros((1, embed_size), jnp.float32),
        # nn.LayerNorm(embed_size) default init
        "ln_gamma": jnp.ones((1, embed_size), jnp.float32),
        "ln_beta": jnp.zeros((1, embed_size), jnp.float32),
    }


# ---------------------------------------------------------------------------
# Pure-JAX reference (mirrors the PyTorch module) for a sanity check
# ---------------------------------------------------------------------------
def _reference(key, query, values, mask, params, *, embed_size, heads):
    N, Lq, E = query.shape
    D = E // heads
    split = lambda x: x.reshape(N, -1, heads, D)
    qh = split(query) @ params["w_q"].T
    kh = split(key) @ params["w_k"].T
    vh = split(values) @ params["w_v"].T
    energy = jnp.einsum("nqhd,nkhd->nhqk", qh, kh)
    energy = jnp.where(mask[:, None, :, :] == 0, -1e20, energy)
    p = jax.nn.softmax(energy / math.sqrt(embed_size), axis=-1)
    att = jnp.einsum("nhqk,nkhd->nqhd", p, vh).reshape(N, Lq, E)
    x = att @ params["w_o"].T + params["b_o"]
    y = query + x
    mu = y.mean(-1, keepdims=True)
    var = ((y - mu) ** 2).mean(-1, keepdims=True)
    return (y - mu) / jnp.sqrt(var + 1e-5) * params["ln_gamma"] \
        + params["ln_beta"]


if __name__ == "__main__":
    N, L, E, H = 2, 8, 32, 4   # batch, seq, embed, heads

    root = jax.random.PRNGKey(0)
    kp, kk, kq, kv = jax.random.split(root, 4)

    params = init_params(kp, E, H)
    key_in = jax.random.normal(kk, (N, L, E), jnp.float32)
    query_in = jax.random.normal(kq, (N, L, E), jnp.float32)
    values_in = jax.random.normal(kv, (N, L, E), jnp.float32)

    # causal mask (N, Lq, Lk): 1 = attend, 0 = masked with -1e20
    mask = jnp.tril(jnp.ones((L, L), jnp.float32))[None].repeat(N, axis=0)

    out = decoder_block1(key_in, query_in, values_in, mask, params,
                         embed_size=E, heads=H)
    jax.block_until_ready(out)

    ref = _reference(key_in, query_in, values_in, mask, params,
                     embed_size=E, heads=H)

    assert out.shape == (N, L, E)
    assert jnp.isfinite(out).all()
    assert jnp.allclose(out, ref, atol=1e-3, rtol=1e-3), \
        float(jnp.max(jnp.abs(out - ref)))
    print("KERNEL_OK")
</pallas_src>

<mosaic_0001>
module attributes {stable_mosaic.version = 11 : i64} {
  func.func @_decoder_block_kernel(%arg0: i32, %arg1: i32, %arg2: memref<1x8x32xf32, #tpu.memory_space<vmem>>, %arg3: memref<1x8x32xf32, #tpu.memory_space<vmem>>, %arg4: memref<1x8x32xf32, #tpu.memory_space<vmem>>, %arg5: memref<1x8x8xi32, #tpu.memory_space<vmem>>, %arg6: memref<32x32xf32, #tpu.memory_space<vmem>>, %arg7: memref<32x32xf32, #tpu.memory_space<vmem>>, %arg8: memref<32x32xf32, #tpu.memory_space<vmem>>, %arg9: memref<32x32xf32, #tpu.memory_space<vmem>>, %arg10: memref<1x32xf32, #tpu.memory_space<vmem>>, %arg11: memref<1x32xf32, #tpu.memory_space<vmem>>, %arg12: memref<1x32xf32, #tpu.memory_space<vmem>>, %arg13: memref<1x8x32xf32, #tpu.memory_space<vmem>>) attributes {dimension_semantics = [#tpu.dimension_semantics<parallel>, #tpu.dimension_semantics<parallel>], iteration_bounds = array<i64: 2, 1>, scalar_prefetch = 0 : i64, scratch_operands = 0 : i64, tpu.core_type = #tpu.core_type<tc>, window_params = [{transform_indices = @transform_0, window_bounds = array<i64: 1, 8, 32>}, {transform_indices = @transform_1, window_bounds = array<i64: 1, 8, 32>}, {transform_indices = @transform_2, window_bounds = array<i64: 1, 8, 32>}, {transform_indices = @transform_3, window_bounds = array<i64: 1, 8, 8>}, {pipeline_mode = #tpu.pipeline_mode<synchronous>, transform_indices = @transform_4, window_bounds = array<i64: 32, 32>}, {pipeline_mode = #tpu.pipeline_mode<synchronous>, transform_indices = @transform_5, window_bounds = array<i64: 32, 32>}, {pipeline_mode = #tpu.pipeline_mode<synchronous>, transform_indices = @transform_6, window_bounds = array<i64: 32, 32>}, {pipeline_mode = #tpu.pipeline_mode<synchronous>, transform_indices = @transform_7, window_bounds = array<i64: 32, 32>}, {pipeline_mode = #tpu.pipeline_mode<synchronous>, transform_indices = @transform_8, window_bounds = array<i64: 1, 32>}, {pipeline_mode = #tpu.pipeline_mode<synchronous>, transform_indices = @transform_9, window_bounds = array<i64: 1, 32>}, {pipeline_mode = #tpu.pipeline_mode<synchronous>, transform_indices = @transform_10, window_bounds = array<i64: 1, 32>}, {transform_indices = @transform_11, window_bounds = array<i64: 1, 8, 32>}]} {
    %c0 = arith.constant 0 : index
    %c0_0 = arith.constant 0 : index
    %c0_1 = arith.constant 0 : index
    %0 = vector.load %arg2[%c0, %c0_0, %c0_1] : memref<1x8x32xf32, #tpu.memory_space<vmem>>, vector<1x8x32xf32>
    %1 = vector.shape_cast %0 : vector<1x8x32xf32> to vector<8x32xf32>
    %c0_2 = arith.constant 0 : index
    %c0_3 = arith.constant 0 : index
    %c0_4 = arith.constant 0 : index
    %2 = vector.load %arg3[%c0_2, %c0_3, %c0_4] : memref<1x8x32xf32, #tpu.memory_space<vmem>>, vector<1x8x32xf32>
    %3 = vector.shape_cast %2 : vector<1x8x32xf32> to vector<8x32xf32>
    %c0_5 = arith.constant 0 : index
    %c0_6 = arith.constant 0 : index
    %c0_7 = arith.constant 0 : index
    %4 = vector.load %arg4[%c0_5, %c0_6, %c0_7] : memref<1x8x32xf32, #tpu.memory_space<vmem>>, vector<1x8x32xf32>
    %5 = vector.shape_cast %4 : vector<1x8x32xf32> to vector<8x32xf32>
    %c0_8 = arith.constant 0 : index
    %c0_9 = arith.constant 0 : index
    %c0_10 = arith.constant 0 : index
    %6 = vector.load %arg5[%c0_8, %c0_9, %c0_10] : memref<1x8x8xi32, #tpu.memory_space<vmem>>, vector<1x8x8xi32>
    %7 = vector.shape_cast %6 : vector<1x8x8xi32> to vector<8x8xi32>
    %c0_11 = arith.constant 0 : index
    %c0_12 = arith.constant 0 : index
    %8 = vector.load %arg6[%c0_11, %c0_12] : memref<32x32xf32, #tpu.memory_space<vmem>>, vector<32x32xf32>
    %cst = arith.constant dense<0.000000e+00> : vector<8x32xf32>
    %9 = tpu.matmul %1, %8, %cst {dimension_numbers = #tpu.dot_dimension_numbers<[1], [0], [0], [1], [0, 0, 1, 1], [], []>} : vector<8x32xf32>, vector<32x32xf32>, vector<8x32xf32> -> vector<8x32xf32>
    %cst_13 = arith.constant 0.176776692 : f32
    %10 = vector.broadcast %cst_13 : f32 to vector<8x32xf32>
    %11 = arith.mulf %9, %10 : vector<8x32xf32>
    %c0_14 = arith.constant 0 : index
    %c0_15 = arith.constant 0 : index
    %12 = vector.load %arg7[%c0_14, %c0_15] : memref<32x32xf32, #tpu.memory_space<vmem>>, vector<32x32xf32>
    %cst_16 = arith.constant dense<0.000000e+00> : vector<8x32xf32>
    %13 = tpu.matmul %3, %12, %cst_16 {dimension_numbers = #tpu.dot_dimension_numbers<[1], [0], [0], [1], [0, 0, 1, 1], [], []>} : vector<8x32xf32>, vector<32x32xf32>, vector<8x32xf32> -> vector<8x32xf32>
    %c0_17 = arith.constant 0 : index
    %c0_18 = arith.constant 0 : index
    %14 = vector.load %arg8[%c0_17, %c0_18] : memref<32x32xf32, #tpu.memory_space<vmem>>, vector<32x32xf32>
    %cst_19 = arith.constant dense<0.000000e+00> : vector<8x32xf32>
    %15 = tpu.matmul %5, %14, %cst_19 {dimension_numbers = #tpu.dot_dimension_numbers<[1], [0], [0], [1], [0, 0, 1, 1], [], []>} : vector<8x32xf32>, vector<32x32xf32>, vector<8x32xf32> -> vector<8x32xf32>
    %c0_i32 = arith.constant 0 : i32
    %16 = vector.broadcast %c0_i32 : i32 to vector<8x8xi32>
    %17 = arith.cmpi eq, %7, %16 : vector<8x8xi32>
    %18 = vector.extract_strided_slice %11 {offsets = [0, 0], sizes = [8, 8], strides = [1, 1]} : vector<8x32xf32> to vector<8x8xf32>
    %19 = vector.extract_strided_slice %13 {offsets = [0, 0], sizes = [8, 8], strides = [1, 1]} : vector<8x32xf32> to vector<8x8xf32>
    %20 = vector.extract_strided_slice %15 {offsets = [0, 0], sizes = [8, 8], strides = [1, 1]} : vector<8x32xf32> to vector<8x8xf32>
    %cst_20 = arith.constant dense<0.000000e+00> : vector<8x8xf32>
    %21 = tpu.matmul %18, %19, %cst_20 {dimension_numbers = #tpu.dot_dimension_numbers<[1], [1], [0], [0], [0, 0, 1, 0], [], []>} : vector<8x8xf32>, vector<8x8xf32>, vector<8x8xf32> -> vector<8x8xf32>
    %cst_21 = arith.constant -1.000000e+20 : f32
    %22 = vector.broadcast %cst_21 : f32 to vector<8x8xf32>
    %23 = arith.select %17, %22, %21 : vector<8x8xi1>, vector<8x8xf32>
    %cst_22 = arith.constant dense<0xFF800000> : vector<8xf32>
    %24 = vector.multi_reduction <maximumf>, %23, %cst_22 [1] : vector<8x8xf32> to vector<8xf32>
    %25 = vector.shape_cast %24 : vector<8xf32> to vector<8x1xf32>
    %26 = vector.broadcast %25 : vector<8x1xf32> to vector<8x8xf32>
    %27 = arith.subf %23, %26 : vector<8x8xf32>
    %28 = math.exp %27 : vector<8x8xf32>
    %cst_23 = arith.constant dense<0.000000e+00> : vector<8xf32>
    %29 = vector.multi_reduction <add>, %28, %cst_23 [1] : vector<8x8xf32> to vector<8xf32>
    %30 = vector.shape_cast %29 : vector<8xf32> to vector<8x1xf32>
    %31 = tpu.reciprocal %30 : vector<8x1xf32> -> vector<8x1xf32>
    %32 = vector.broadcast %31 : vector<8x1xf32> to vector<8x8xf32>
    %33 = arith.mulf %28, %32 : vector<8x8xf32>
    %cst_24 = arith.constant dense<0.000000e+00> : vector<8x8xf32>
    %34 = tpu.matmul %33, %20, %cst_24 {dimension_numbers = #tpu.dot_dimension_numbers<[1], [0], [0], [1], [0, 0, 1, 1], [], []>} : vector<8x8xf32>, vector<8x8xf32>, vector<8x8xf32> -> vector<8x8xf32>
    %35 = vector.extract_strided_slice %11 {offsets = [0, 8], sizes = [8, 8], strides = [1, 1]} : vector<8x32xf32> to vector<8x8xf32>
    %36 = vector.extract_strided_slice %13 {offsets = [0, 8], sizes = [8, 8], strides = [1, 1]} : vector<8x32xf32> to vector<8x8xf32>
    %37 = vector.extract_strided_slice %15 {offsets = [0, 8], sizes = [8, 8], strides = [1, 1]} : vector<8x32xf32> to vector<8x8xf32>
    %cst_25 = arith.constant dense<0.000000e+00> : vector<8x8xf32>
    %38 = tpu.matmul %35, %36, %cst_25 {dimension_numbers = #tpu.dot_dimension_numbers<[1], [1], [0], [0], [0, 0, 1, 0], [], []>} : vector<8x8xf32>, vector<8x8xf32>, vector<8x8xf32> -> vector<8x8xf32>
    %cst_26 = arith.constant -1.000000e+20 : f32
    %39 = vector.broadcast %cst_26 : f32 to vector<8x8xf32>
    %40 = arith.select %17, %39, %38 : vector<8x8xi1>, vector<8x8xf32>
    %cst_27 = arith.constant dense<0xFF800000> : vector<8xf32>
    %41 = vector.multi_reduction <maximumf>, %40, %cst_27 [1] : vector<8x8xf32> to vector<8xf32>
    %42 = vector.shape_cast %41 : vector<8xf32> to vector<8x1xf32>
    %43 = vector.broadcast %42 : vector<8x1xf32> to vector<8x8xf32>
    %44 = arith.subf %40, %43 : vector<8x8xf32>
    %45 = math.exp %44 : vector<8x8xf32>
    %cst_28 = arith.constant dense<0.000000e+00> : vector<8xf32>
    %46 = vector.multi_reduction <add>, %45, %cst_28 [1] : vector<8x8xf32> to vector<8xf32>
    %47 = vector.shape_cast %46 : vector<8xf32> to vector<8x1xf32>
    %48 = tpu.reciprocal %47 : vector<8x1xf32> -> vector<8x1xf32>
    %49 = vector.broadcast %48 : vector<8x1xf32> to vector<8x8xf32>
    %50 = arith.mulf %45, %49 : vector<8x8xf32>
    %cst_29 = arith.constant dense<0.000000e+00> : vector<8x8xf32>
    %51 = tpu.matmul %50, %37, %cst_29 {dimension_numbers = #tpu.dot_dimension_numbers<[1], [0], [0], [1], [0, 0, 1, 1], [], []>} : vector<8x8xf32>, vector<8x8xf32>, vector<8x8xf32> -> vector<8x8xf32>
    %52 = vector.extract_strided_slice %11 {offsets = [0, 16], sizes = [8, 8], strides = [1, 1]} : vector<8x32xf32> to vector<8x8xf32>
    %53 = vector.extract_strided_slice %13 {offsets = [0, 16], sizes = [8, 8], strides = [1, 1]} : vector<8x32xf32> to vector<8x8xf32>
    %54 = vector.extract_strided_slice %15 {offsets = [0, 16], sizes = [8, 8], strides = [1, 1]} : vector<8x32xf32> to vector<8x8xf32>
    %cst_30 = arith.constant dense<0.000000e+00> : vector<8x8xf32>
    %55 = tpu.matmul %52, %53, %cst_30 {dimension_numbers = #tpu.dot_dimension_numbers<[1], [1], [0], [0], [0, 0, 1, 0], [], []>} : vector<8x8xf32>, vector<8x8xf32>, vector<8x8xf32> -> vector<8x8xf32>
    %cst_31 = arith.constant -1.000000e+20 : f32
    %56 = vector.broadcast %cst_31 : f32 to vector<8x8xf32>
    %57 = arith.select %17, %56, %55 : vector<8x8xi1>, vector<8x8xf32>
    %cst_32 = arith.constant dense<0xFF800000> : vector<8xf32>
    %58 = vector.multi_reduction <maximumf>, %57, %cst_32 [1] : vector<8x8xf32> to vector<8xf32>
    %59 = vector.shape_cast %58 : vector<8xf32> to vector<8x1xf32>
    %60 = vector.broadcast %59 : vector<8x1xf32> to vector<8x8xf32>
    %61 = arith.subf %57, %60 : vector<8x8xf32>
    %62 = math.exp %61 : vector<8x8xf32>
    %cst_33 = arith.constant dense<0.000000e+00> : vector<8xf32>
    %63 = vector.multi_reduction <add>, %62, %cst_33 [1] : vector<8x8xf32> to vector<8xf32>
    %64 = vector.shape_cast %63 : vector<8xf32> to vector<8x1xf32>
    %65 = tpu.reciprocal %64 : vector<8x1xf32> -> vector<8x1xf32>
    %66 = vector.broadcast %65 : vector<8x1xf32> to vector<8x8xf32>
    %67 = arith.mulf %62, %66 : vector<8x8xf32>
    %cst_34 = arith.constant dense<0.000000e+00> : vector<8x8xf32>
    %68 = tpu.matmul %67, %54, %cst_34 {dimension_numbers = #tpu.dot_dimension_numbers<[1], [0], [0], [1], [0, 0, 1, 1], [], []>} : vector<8x8xf32>, vector<8x8xf32>, vector<8x8xf32> -> vector<8x8xf32>
    %69 = vector.extract_strided_slice %11 {offsets = [0, 24], sizes = [8, 8], strides = [1, 1]} : vector<8x32xf32> to vector<8x8xf32>
    %70 = vector.extract_strided_slice %13 {offsets = [0, 24], sizes = [8, 8], strides = [1, 1]} : vector<8x32xf32> to vector<8x8xf32>
    %71 = vector.extract_strided_slice %15 {offsets = [0, 24], sizes = [8, 8], strides = [1, 1]} : vector<8x32xf32> to vector<8x8xf32>
    %cst_35 = arith.constant dense<0.000000e+00> : vector<8x8xf32>
    %72 = tpu.matmul %69, %70, %cst_35 {dimension_numbers = #tpu.dot_dimension_numbers<[1], [1], [0], [0], [0, 0, 1, 0], [], []>} : vector<8x8xf32>, vector<8x8xf32>, vector<8x8xf32> -> vector<8x8xf32>
    %cst_36 = arith.constant -1.000000e+20 : f32
    %73 = vector.broadcast %cst_36 : f32 to vector<8x8xf32>
    %74 = arith.select %17, %73, %72 : vector<8x8xi1>, vector<8x8xf32>
    %cst_37 = arith.constant dense<0xFF800000> : vector<8xf32>
    %75 = vector.multi_reduction <maximumf>, %74, %cst_37 [1] : vector<8x8xf32> to vector<8xf32>
    %76 = vector.shape_cast %75 : vector<8xf32> to vector<8x1xf32>
    %77 = vector.broadcast %76 : vector<8x1xf32> to vector<8x8xf32>
    %78 = arith.subf %74, %77 : vector<8x8xf32>
    %79 = math.exp %78 : vector<8x8xf32>
    %cst_38 = arith.constant dense<0.000000e+00> : vector<8xf32>
    %80 = vector.multi_reduction <add>, %79, %cst_38 [1] : vector<8x8xf32> to vector<8xf32>
    %81 = vector.shape_cast %80 : vector<8xf32> to vector<8x1xf32>
    %82 = tpu.reciprocal %81 : vector<8x1xf32> -> vector<8x1xf32>
    %83 = vector.broadcast %82 : vector<8x1xf32> to vector<8x8xf32>
    %84 = arith.mulf %79, %83 : vector<8x8xf32>
    %cst_39 = arith.constant dense<0.000000e+00> : vector<8x8xf32>
    %85 = tpu.matmul %84, %71, %cst_39 {dimension_numbers = #tpu.dot_dimension_numbers<[1], [0], [0], [1], [0, 0, 1, 1], [], []>} : vector<8x8xf32>, vector<8x8xf32>, vector<8x8xf32> -> vector<8x8xf32>
    %86 = tpu.concatenate %34, %51, %68, %85 in 1 : vector<8x8xf32>, vector<8x8xf32>, vector<8x8xf32>, vector<8x8xf32> -> vector<8x32xf32>
    %c0_40 = arith.constant 0 : index
    %c0_41 = arith.constant 0 : index
    %87 = vector.load %arg9[%c0_40, %c0_41] : memref<32x32xf32, #tpu.memory_space<vmem>>, vector<32x32xf32>
    %cst_42 = arith.constant dense<0.000000e+00> : vector<8x32xf32>
    %88 = tpu.matmul %86, %87, %cst_42 {dimension_numbers = #tpu.dot_dimension_numbers<[1], [0], [0], [1], [0, 0, 1, 1], [], []>} : vector<8x32xf32>, vector<32x32xf32>, vector<8x32xf32> -> vector<8x32xf32>
    %c0_43 = arith.constant 0 : index
    %c0_44 = arith.constant 0 : index
    %89 = vector.load %arg10[%c0_43, %c0_44] : memref<1x32xf32, #tpu.memory_space<vmem>>, vector<1x32xf32>
    %90 = vector.broadcast %89 : vector<1x32xf32> to vector<8x32xf32>
    %91 = arith.addf %88, %90 : vector<8x32xf32>
    %92 = arith.addf %1, %91 : vector<8x32xf32>
    %cst_45 = arith.constant dense<0.000000e+00> : vector<8xf32>
    %93 = vector.multi_reduction <add>, %92, %cst_45 [1] : vector<8x32xf32> to vector<8xf32>
    %94 = vector.shape_cast %93 : vector<8xf32> to vector<8x1xf32>
    %cst_46 = arith.constant 3.200000e+01 : f32
    %95 = vector.broadcast %cst_46 : f32 to vector<8x1xf32>
    %96 = arith.divf %94, %95 : vector<8x1xf32>
    %97 = vector.broadcast %96 : vector<8x1xf32> to vector<8x32xf32>
    %98 = arith.subf %92, %97 : vector<8x32xf32>
    %99 = arith.mulf %98, %98 : vector<8x32xf32>
    %cst_47 = arith.constant dense<0.000000e+00> : vector<8xf32>
    %100 = vector.multi_reduction <add>, %99, %cst_47 [1] : vector<8x32xf32> to vector<8xf32>
    %101 = vector.shape_cast %100 : vector<8xf32> to vector<8x1xf32>
    %cst_48 = arith.constant 3.200000e+01 : f32
    %102 = vector.broadcast %cst_48 : f32 to vector<8x1xf32>
    %103 = arith.divf %101, %102 : vector<8x1xf32>
    %104 = vector.broadcast %96 : vector<8x1xf32> to vector<8x32xf32>
    %105 = arith.subf %92, %104 : vector<8x32xf32>
    %cst_49 = arith.constant 9.99999974E-6 : f32
    %106 = vector.broadcast %cst_49 : f32 to vector<8x1xf32>
    %107 = arith.addf %103, %106 : vector<8x1xf32>
    %108 = math.rsqrt %107 : vector<8x1xf32>
    %109 = vector.broadcast %108 : vector<8x1xf32> to vector<8x32xf32>
    %110 = arith.mulf %105, %109 : vector<8x32xf32>
    %c0_50 = arith.constant 0 : index
    %c0_51 = arith.constant 0 : index
    %111 = vector.load %arg11[%c0_50, %c0_51] : memref<1x32xf32, #tpu.memory_space<vmem>>, vector<1x32xf32>
    %112 = vector.broadcast %111 : vector<1x32xf32> to vector<8x32xf32>
    %113 = arith.mulf %110, %112 : vector<8x32xf32>
    %c0_52 = arith.constant 0 : index
    %c0_53 = arith.constant 0 : index
    %114 = vector.load %arg12[%c0_52, %c0_53] : memref<1x32xf32, #tpu.memory_space<vmem>>, vector<1x32xf32>
    %115 = vector.broadcast %114 : vector<1x32xf32> to vector<8x32xf32>
    %116 = arith.addf %113, %115 : vector<8x32xf32>
    %c0_54 = arith.constant 0 : index
    %c0_55 = arith.constant 0 : index
    %c0_56 = arith.constant 0 : index
    %117 = vector.load %arg13[%c0_54, %c0_55, %c0_56] : memref<1x8x32xf32, #tpu.memory_space<vmem>>, vector<1x8x32xf32>
    %118 = vector.shape_cast %117 : vector<1x8x32xf32> to vector<8x32xf32>
    %119 = vector.shape_cast %116 : vector<8x32xf32> to vector<1x8x32xf32>
    tpu.vector_store %arg13[%c0_54, %c0_55, %c0_56], %119 {strides = array<i32>} : memref<1x8x32xf32, #tpu.memory_space<vmem>>, vector<1x8x32xf32>,
    return
  }
  func.func @transform_0(%arg0: i32, %arg1: i32) -> (i32, i32, i32) {
    %c0_i32 = arith.constant 0 : i32
    %c0_i32_0 = arith.constant 0 : i32
    return %arg0, %arg1, %c0_i32 : i32, i32, i32
  }
  func.func @transform_1(%arg0: i32, %arg1: i32) -> (i32, i32, i32) {
    %c0_i32 = arith.constant 0 : i32
    %c0_i32_0 = arith.constant 0 : i32
    %c0_i32_1 = arith.constant 0 : i32
    return %arg0, %c0_i32, %c0_i32_0 : i32, i32, i32
  }
  func.func @transform_2(%arg0: i32, %arg1: i32) -> (i32, i32, i32) {
    %c0_i32 = arith.constant 0 : i32
    %c0_i32_0 = arith.constant 0 : i32
    %c0_i32_1 = arith.constant 0 : i32
    return %arg0, %c0_i32, %c0_i32_0 : i32, i32, i32
  }
  func.func @transform_3(%arg0: i32, %arg1: i32) -> (i32, i32, i32) {
    %c0_i32 = arith.constant 0 : i32
    %c0_i32_0 = arith.constant 0 : i32
    return %arg0, %arg1, %c0_i32 : i32, i32, i32
  }
  func.func @transform_4(%arg0: i32, %arg1: i32) -> (i32, i32) {
    %c0_i32 = arith.constant 0 : i32
    %c0_i32_0 = arith.constant 0 : i32
    %c0_i32_1 = arith.constant 0 : i32
    return %c0_i32, %c0_i32_0 : i32, i32
  }
  func.func @transform_5(%arg0: i32, %arg1: i32) -> (i32, i32) {
    %c0_i32 = arith.constant 0 : i32
    %c0_i32_0 = arith.constant 0 : i32
    %c0_i32_1 = arith.constant 0 : i32
    return %c0_i32, %c0_i32_0 : i32, i32
  }
  func.func @transform_6(%arg0: i32, %arg1: i32) -> (i32, i32) {
    %c0_i32 = arith.constant 0 : i32
    %c0_i32_0 = arith.constant 0 : i32
    %c0_i32_1 = arith.constant 0 : i32
    return %c0_i32, %c0_i32_0 : i32, i32
  }
  func.func @transform_7(%arg0: i32, %arg1: i32) -> (i32, i32) {
    %c0_i32 = arith.constant 0 : i32
    %c0_i32_0 = arith.constant 0 : i32
    %c0_i32_1 = arith.constant 0 : i32
    return %c0_i32, %c0_i32_0 : i32, i32
  }
  func.func @transform_8(%arg0: i32, %arg1: i32) -> (i32, i32) {
    %c0_i32 = arith.constant 0 : i32
    %c0_i32_0 = arith.constant 0 : i32
    %c0_i32_1 = arith.constant 0 : i32
    return %c0_i32, %c0_i32_0 : i32, i32
  }
  func.func @transform_9(%arg0: i32, %arg1: i32) -> (i32, i32) {
    %c0_i32 = arith.constant 0 : i32
    %c0_i32_0 = arith.constant 0 : i32
    %c0_i32_1 = arith.constant 0 : i32
    return %c0_i32, %c0_i32_0 : i32, i32
  }
  func.func @transform_10(%arg0: i32, %arg1: i32) -> (i32, i32) {
    %c0_i32 = arith.constant 0 : i32
    %c0_i32_0 = arith.constant 0 : i32
    %c0_i32_1 = arith.constant 0 : i32
    return %c0_i32, %c0_i32_0 : i32, i32
  }
  func.func @transform_11(%arg0: i32, %arg1: i32) -> (i32, i32, i32) {
    %c0_i32 = arith.constant 0 : i32
    %c0_i32_0 = arith.constant 0 : i32
    return %arg0, %arg1, %c0_i32 : i32, i32, i32
  }
}

</mosaic_0001>

<bundles_post_ra>
// kernel: tpu_custom_call.1
= control target key start
LH: loop header
LB: loop body
LE: loop exit
PB: predicated region body
PF: predicated region fallthrough
CT: control target
= control target key end

     0   :  { %s3103_s0 = inlined_call_operand.hbm [shape: f32[2,8,32], index: 0, kind: input, shape index: {}]   ;;  %s3104_s1 = inlined_call_operand.hbm [shape: f32[2,8,32], index: 1, kind: input, shape index: {}]   ;;  %s3105_s2 = inlined_call_operand.hbm [shape: f32[2,8,32], index: 2, kind: input, shape index: {}]   ;;  %s3106_s3 = inlined_call_operand.hbm [shape: s32[2,8,8], index: 3, kind: input, shape index: {}]   ;;  %s3107_s4 = inlined_call_operand.hbm [shape: f32[32,32], index: 4, kind: input, shape index: {}]   ;;  %s3108_s5 = inlined_call_operand.hbm [shape: f32[32,32], index: 5, kind: input, shape index: {}]   ;;  %s3109_s6 = inlined_call_operand.hbm [shape: f32[32,32], index: 6, kind: input, shape index: {}]   ;;  %s3110_s7 = inlined_call_operand.hbm [shape: f32[32,32], index: 7, kind: input, shape index: {}]   ;;  %s3111_s8 = inlined_call_operand.vmem [shape: f32[1,32], index: 8, kind: input, shape index: {}]   ;;  %s3112_s9 = inlined_call_operand.vmem [shape: f32[1,32], index: 9, kind: input, shape index: {}]   ;;  %s3113_s10 = inlined_call_operand.vmem [shape: f32[1,32], index: 10, kind: input, shape index: {}]   ;;  %s3114_s11 = inlined_call_operand.hbm [shape: f32[2,8,32], index: 11, kind: output, shape index: {}]  }
   0x1   :  { %3138 = sst [smem:[#allocation31_spill]] %s3104_s1 }
   0x2   :  { %3139 = sst [smem:[#allocation32_spill]] %s3107_s4 }
   0x3   :  { %3140 = sst [smem:[#allocation33_spill]] %s3108_s5 }
   0x4   :  { %3141 = sst [smem:[#allocation34_spill]] %s3111_s8 }
   0x5   :  { %3142 = sst [smem:[#allocation35_spill]] %s3112_s9 }
   0x6   :  { %3143 = sst [smem:[#allocation36_spill]] %s3113_s10 }
   0x7   :  { %3144 = sst [smem:[#allocation37_spill]] %s3114_s11 }
   0x8   :  { %16 = vsyncpa [#allocation3], 0 }
   0x9   :  { %18 = vsyncpa [#allocation3 + $0x1], 0 }
   0xa   :  { %19 = vsyncpa [#allocation6], 0 }
   0xb   :  { %21 = vsyncpa [#allocation6 + $0x1], 0 }
   0xc   :  { %22 = vsyncpa [#allocation9], 0 }
   0xd   :  { %24 = vsyncpa [#allocation9 + $0x1], 0 }
   0xe   :  { %25 = vsyncpa [#allocation12], 0 }
   0xf   :  { %26 = vsyncpa [#allocation15], 0 }
  0x10   :  { %27 = vsyncpa [#allocation4], 0 }
  0x11   :  { %29 = vsyncpa [#allocation4 + $0x1], 0  ;;  %s2576_s17 = smov 0   ;;  %s2578_s18 = smov 0  }
  0x12   :  { %s2580_s19 = smov 0   ;;  %s2582_s20 = smov 0  }
  0x13   :  { %s2584_s21 = smov 0   ;;  %s2586_s22 = smov 0  }
  0x14 LB: > { %3145 = sst [smem:[#allocation24_spill]] %s2474_s17  ;;  %s2607_s23 = sadd.s32 4294967295, %s2494_s22   ;;  %s2494_s22 = sphi %s2586_s22, %s35_s22   ;;  %s2490_s21 = sphi %s2584_s21, %s3194_s21   ;;  %s2486_s20 = sphi %s2582_s20, %s3193_s20   ;;  %s2482_s19 = sphi %s2580_s19, %s3197_s19   ;;  %s2478_s18 = sphi %s2578_s18, %s3196_s18   ;;  %s2474_s17 = sphi %s2576_s17, %s3195_s17  }
  0x15   : > { %3146 = sst [smem:[#allocation25_spill]] %s2486_s20  ;;  %s1821_s24 = sadd.s32 4294967294, %s2494_s22  }
  0x16   : > { %3147 = sst [smem:[#allocation26_spill]] %s2490_s21  ;;  %p69_p0 = scmp.ne.s32.totalorder %s2478_s18, %s2474_s17 }
  0x17   : > { %p3117_p1 = scmp.eq.s32.totalorder %s2607_s23, 0  ;;  %p328_p3 = scmp.eq.s32.totalorder %s1821_s24, 1 }
  0x18   : > { %p1822_p5 = scmp.ge.s32.totalorder %s2494_s22, 1  ;;  %p335_p7 = scmp.lt.s32.totalorder %s2494_s22, 3 }
  0x19   : > { %p2616_p4 = por %p3117_p1, %p69_p0  ;;  %p2621_p6 = por %p328_p3, %p69_p0 }
  0x1a   : > { %p2626_p8 = pnand %p1822_p5, %p335_p7  ;;  %s2496_s28 = smov [#allocation10]  }
  0x1b   : > { %s3148_s25 = scalar_select %p2616_p4, 1, 0 }
  0x1c   : > { %s3149_s26 = scalar_select %p2621_p6, 1, 0 }
  0x1d   : > { %s3151_s27 = scalar_select %p2626_p8, 1, 0 }
  0x1e   : > { %3150 = sst [smem:[#allocation27_spill]] %s3149_s26  ;;  %s347_s29 = sshll.u32 %s2496_s28, 4  ;;  %s2630_s29 = int_to_ptr.vmem [resolvable:$true] %s347_s29 }
  0x1f   : > { %p2039_p9 = pneg %p2626_p8  ;;  %s2497_s12 = smov [#allocation11]  }
  0x20   : > { %s360_s13 = sshll.u32 %s2497_s12, 4  ;;  %s3153_s4 = sld [smem:[#allocation32_spill]]  ;;  %s2641_s13 = int_to_ptr.vmem [resolvable:$true] %s360_s13 }
  0x21   : > { %p2637_p11 = pnand %p2039_p9, %p3117_p1 }
  0x23   : > { %s3152_s30 = scalar_select %p2637_p11, 1, 0 }
  0x24   : > { %p2651_p13 = pneg %p2637_p11 }
  0x26   : > { %s2160_s16 = scalar_lea.hbm %s3153_s4, 512 }
  0x27   : > { %p2161_p12 = scmp.ne.s32.totalorder %s3153_s4, %s2160_s16  ;;  %p2167_p5 = scmp.lt.u32.totalorder %s2160_s16, %s3153_s4 }
  0x28   : > { %s3154_s26 = scalar_select %p2651_p13, 1, 0 }
  0x29   : > { %p2163_p0 = pnand %p2651_p13, %p2161_p12 }
  0x2b   : > { %p2164_p3 = pneg %p2163_p0 }
  0x2d   : > { %p2169_p7 = pnand %p2167_p5, %p2164_p3 }
  0x2f   : > { %2172 = shalt.err (!%p2169_p7)
}
  0x30   : > { %s2173_s14 = scalar_lea.vmem %s2630_s29, 512  ;;  %p2181_p2 = scmp.lt.s32.totalorder %s2630_s29, %s2630_s29 }
  0x31   : > { %p2174_p9 = scmp.ne.s32.totalorder %s2630_s29, %s2173_s14  ;;  %p2182_p6 = scmp.lt.s32.totalorder %s2173_s14, %s2173_s14 }
  0x33   : > { %p2176_p10 = pnand %p2174_p9, %p2651_p13  ;;  %p2183_p12 = por %p2182_p6, %p2181_p2 }
  0x35   : > { %p2177_p1 = pneg %p2176_p10 }
  0x37   : > { %p2184_p0 = pnand %p2183_p12, %p2177_p1 }
  0x39   : > { %2187 = shalt.err (!%p2184_p0)
}
  0x3a   : > { %s3119_s15 = smov 128   ;;  %s3121_s17 = smov 8  }
  0x3b   : > { %2042 = dma.hbm_to_vmem [thread:$0]  (!%p2637_p11), %s3153_s4, 512, %s2630_s29, [#allocation9], %s3119_s15, %s3119_s15, %s3121_s17  }
  0x3c   : > { %s3155_s5 = sld [smem:[#allocation33_spill]] }
  0x42   : > { %s2188_s14 = scalar_lea.hbm %s3155_s5, 512 }
  0x43   : > { %p2189_p1 = scmp.ne.s32.totalorder %s3155_s5, %s2188_s14  ;;  %p2195_p10 = scmp.lt.u32.totalorder %s2188_s14, %s3155_s5 }
  0x45   : > { %p2191_p2 = pnand %p2189_p1, %p2651_p13 }
  0x47   : > { %p2192_p6 = pneg %p2191_p2 }
  0x49   : > { %p2197_p3 = pnand %p2195_p10, %p2192_p6 }
  0x4b   : > { %2200 = shalt.err (!%p2197_p3)
}
  0x4c   : > { %s2201_s29 = scalar_lea.vmem %s2641_s13, 512  ;;  %p2209_p12 = scmp.lt.s32.totalorder %s2641_s13, %s2641_s13 }
  0x4d   : > { %p2202_p5 = scmp.ne.s32.totalorder %s2641_s13, %s2201_s29  ;;  %p2210_p0 = scmp.lt.s32.totalorder %s2201_s29, %s2201_s29 }
  0x4f   : > { %p2204_p7 = pnand %p2202_p5, %p2651_p13  ;;  %p2211_p1 = por %p2210_p0, %p2209_p12 }
  0x51   : > { %p2205_p9 = pneg %p2204_p7 }
  0x53   : > { %p2212_p2 = pnand %p2211_p1, %p2205_p9 }
  0x55   : > { %2215 = shalt.err (!%p2212_p2)
}
  0x56   : > { %2045 = dma.hbm_to_vmem [thread:$0]  (!%p2637_p11), %s3155_s5, 512, %s2641_s13, [#allocation12], %s3119_s15, %s3119_s15, %s3121_s17  }
  0x57   : > { %s47_s11 = sadd.s32 1, %s2490_s21  ;;  %s56_s20 = sadd.s32 1, %s2482_s19 }
  0x58   : > { %p49_p6 = scmp.ge.s32.totalorder %s47_s11, 2  ;;  %p63_p10 = scmp.ne.s32.totalorder %s2482_s19, %s2478_s18 }
  0x59   : > { %p64_p3 = scmp.eq.s32.totalorder %s2494_s22, 0  ;;  %p2073_p5 = scmp.lt.s32.totalorder %s2494_s22, 2 }
  0x5a   : > { %s3199_s11 = smov (%p49_p6, %s47_s11), 0  ;;  %p3157_p9 = scmp.eq.s32.totalorder %s2607_s23, 1 }
  0x5b   : > { %3156 = sst [smem:[#allocation28_spill]] %s3199_s11  ;;  %p65_p7 = por %p64_p3, %p63_p10 }
  0x5c   : > { %p2711_p12 = por %p3157_p9, %p63_p10  ;;  %s51_s24 = ssub.s32 %s2490_s21, %s3199_s11 }
  0x5d   : > { %s3123_s13 = sand.u32 1, %s2482_s19   ;;  %p54_p0 = scmp.eq.s32.totalorder %s51_s24, 0 }
  0x5e   : > { %s3158_s16 = scalar_select %p2711_p12, 1, 0 }
  0x5f   : > { %s2720_s28 = sshll.u32 %s3123_s13, 3  ;;  %s2723_s12 = sshll.u32 %s2490_s21, 7 }
  0x60   : > { %3159 = sst [smem:[#allocation29_spill]] %s3158_s16  ;;  %p2725_p1 = pnand %p2073_p5, %p65_p7 }
  0x61   : > { %s2730_s29 = scalar_select %p54_p0, %s2482_s19, %s56_s20  }
  0x62   : > { %s3160_s14 = scalar_select %p2725_p1, 1, 0 }
  0x63   : > { %3161 = sst [smem:[#allocation30_spill]] %s2730_s29  ;;  %s3128_s9 = sand.u32 1, %s2494_s22  }
  0x64   : > { %s3162_s1 = sld [smem:[#allocation31_spill]]  ;;  %s432_s24 = scalar_lea.vmem [#allocation5], %s2720_s28 }
  0x65   : > { %s439_s13 = sshll.u32 %s432_s24, 4  ;;  %s2744_s4 = scalar_lea.sflag [#allocation6], %s3128_s9  ;;  %s2740_s13 = int_to_ptr.vmem [resolvable:$true] %s439_s13 }
  0x66   : > { %p2750_p6 = pneg %p2725_p1 }
  0x6a   : > { %s2737_s17 = scalar_lea.hbm %s3162_s1, %s2723_s12  ;;  %s2221_s24 = scalar_lea.hbm %s3162_s1, 256 }
  0x6b   : > { %s2216_s5 = scalar_lea.hbm %s2737_s17, 128  ;;  %p2222_p5 = scmp.lt.u32.totalorder %s2737_s17, %s3162_s1 }
  0x6c   : > { %p2217_p2 = scmp.ne.s32.totalorder %s2737_s17, %s2216_s5  ;;  %p2223_p7 = scmp.lt.u32.totalorder %s2221_s24, %s2216_s5 }
  0x6d   : > { %p2225_p0 = scmp.lt.u32.totalorder %s2216_s5, %s2737_s17 }
  0x6e   : > { %p2219_p10 = pnand %p2750_p6, %p2217_p2  ;;  %p2224_p9 = por %p2223_p7, %p2222_p5 }
  0x70   : > { %p2220_p3 = pneg %p2219_p10  ;;  %p2226_p12 = por %p2225_p0, %p2224_p9 }
  0x72   : > { %p2227_p4 = pnand %p2226_p12, %p2220_p3 }
  0x74   : > { %2230 = shalt.err (!%p2227_p4)
}
  0x75   : > { %s2231_s9 = scalar_lea.vmem %s2740_s13, 128  ;;  %s2500_s15 = smov [#allocation5]  }
  0x76   : > { %p2232_p2 = scmp.ne.s32.totalorder %s2740_s13, %s2231_s9  ;;  %s2236_s10 = sshll.u32 %s2500_s15, 4  ;;  %s2237_s10 = int_to_ptr.vmem [resolvable:$false] %s2236_s10 }
  0x77   : > { %s2238_s21 = scalar_lea.vmem %s2237_s10, 256  ;;  %p2239_p11 = scmp.lt.s32.totalorder %s2740_s13, %s2237_s10 }
  0x78   : > { %p2234_p10 = pnand %p2232_p2, %p2750_p6  ;;  %p2240_p13 = scmp.lt.s32.totalorder %s2238_s21, %s2231_s9 }
  0x7a   : > { %p2235_p8 = pneg %p2234_p10  ;;  %p2241_p5 = por %p2240_p13, %p2239_p11 }
  0x7c   : > { %p2242_p7 = pnand %p2241_p5, %p2235_p8 }
  0x7e   : > { %2245 = shalt.err (!%p2242_p7)
}
  0x7f   : > { %2058 = dma.hbm_to_vmem [thread:$0]  (!%p2725_p1), %s2737_s17, 128, %s2740_s13, %s2744_s4  }
  0x80   : > { %s2501_s5 = smov [#allocation13]   ;;  %s2502_s24 = smov [#allocation14]  }
  0x81   : > { %s373_s11 = sshll.u32 %s2501_s5, 4  ;;  %s386_s1 = sshll.u32 %s2502_s24, 4  ;;  %s374_s11 = int_to_ptr.vmem [resolvable:$true] %s373_s11  ;;  %s2774_s1 = int_to_ptr.vmem [resolvable:$true] %s386_s1 }
  0x82   : > { %s2246_s9 = scalar_lea.hbm %s3109_s6, 512  ;;  %p3164_p8 = scmp.ne.s32.totalorder %s3154_s26, 0 }
  0x83   : > { %p2247_p4 = scmp.ne.s32.totalorder %s3109_s6, %s2246_s9  ;;  %p2253_p12 = scmp.lt.u32.totalorder %s2246_s9, %s3109_s6 }
  0x85   : > { %p2249_p11 = pnand %p2247_p4, %p3164_p8 }
  0x87   : > { %p2250_p13 = pneg %p2249_p11 }
  0x89   : > { %p2255_p3 = pnand %p2253_p12, %p2250_p13 }
  0x8b   : > { %2258 = shalt.err (!%p2255_p3)
}
  0x8c   : > { %s2259_s13 = scalar_lea.vmem %s374_s11, 512  ;;  %p2267_p10 = scmp.lt.s32.totalorder %s374_s11, %s374_s11 }
  0x8d   : > { %p2260_p9 = scmp.ne.s32.totalorder %s374_s11, %s2259_s13  ;;  %p2268_p5 = scmp.lt.s32.totalorder %s2259_s13, %s2259_s13 }
  0x8f   : > { %p2262_p0 = pnand %p2260_p9, %p3164_p8  ;;  %p2269_p7 = por %p2268_p5, %p2267_p10 }
  0x91   : > { %p2263_p2 = pneg %p2262_p0 }
  0x93   : > { %p2270_p1 = pnand %p2269_p7, %p2263_p2 }
  0x95   : > { %2273 = shalt.err (!%p2270_p1)
}
  0x96   : > { %p3165_p4 = scmp.ne.s32.totalorder %s3152_s30, 0  ;;  %s3166_s29 = smov 8  }
  0x97   : > { %s3167_s5 = smov 128   ;;  %s2274_s9 = scalar_lea.hbm %s3110_s7, 512 }
  0x98   : > { %2048 = dma.hbm_to_vmem [thread:$0]  (!%p3165_p4), %s3109_s6, 512, %s374_s11, [#allocation12], %s3167_s5, %s3167_s5, %s3166_s29  }
  0x99   : > { %p2275_p11 = scmp.ne.s32.totalorder %s3110_s7, %s2274_s9  ;;  %p2281_p12 = scmp.lt.u32.totalorder %s2274_s9, %s3110_s7 }
  0x9b   : > { %p2277_p1 = pnand %p2275_p11, %p3164_p8 }
  0x9d   : > { %p2278_p13 = pneg %p2277_p1 }
  0x9f   : > { %p2283_p3 = pnand %p2281_p12, %p2278_p13 }
  0xa1   : > { %2286 = shalt.err (!%p2283_p3)
}
  0xa2   : > { %s2287_s11 = scalar_lea.vmem %s2774_s1, 512  ;;  %p2295_p10 = scmp.lt.s32.totalorder %s2774_s1, %s2774_s1 }
  0xa3   : > { %p2288_p9 = scmp.ne.s32.totalorder %s2774_s1, %s2287_s11  ;;  %p2296_p5 = scmp.lt.s32.totalorder %s2287_s11, %s2287_s11 }
  0xa5   : > { %p2290_p0 = pnand %p2288_p9, %p3164_p8  ;;  %p2297_p7 = por %p2296_p5, %p2295_p10 }
  0xa7   : > { %p2291_p2 = pneg %p2290_p0 }
  0xa9   : > { %p2298_p11 = pnand %p2297_p7, %p2291_p2 }
  0xab   : > { %2301 = shalt.err (!%p2298_p11)
}
  0xac   : > { %2051 = dma.hbm_to_vmem [thread:$0]  (!%p3165_p4), %s3110_s7, 512, %s2774_s1, [#allocation15], %s3167_s5, %s3167_s5, %s3166_s29  }
  0xad   : > { %s2827_s15 = scalar_lea.hbm %s3103_s0, %s2723_s12  ;;  %s413_s30 = scalar_lea.vmem [#allocation2], %s2720_s28 }
  0xae   : > { %s421_s10 = sshll.u32 %s413_s30, 4  ;;  %s3168_s9 = sand.u32 1, %s2482_s19   ;;  %s422_s10 = int_to_ptr.vmem [resolvable:$true] %s421_s10 }
  0xaf   : > { %s410_s21 = scalar_lea.sflag [#allocation3], %s3168_s9  ;;  %s2302_s17 = scalar_lea.hbm %s2827_s15, 128 }
  0xb0   : > { %p2303_p8 = scmp.ne.s32.totalorder %s2827_s15, %s2302_s17  ;;  %s2307_s5 = scalar_lea.hbm %s3103_s0, 256 }
  0xb1   : > { %p2308_p4 = scmp.lt.u32.totalorder %s2827_s15, %s3103_s0  ;;  %p2309_p12 = scmp.lt.u32.totalorder %s2307_s5, %s2302_s17 }
  0xb2   : > { %p2305_p1 = pnand %p2303_p8, %p2750_p6  ;;  %p2311_p9 = scmp.lt.u32.totalorder %s2302_s17, %s2827_s15 }
  0xb3   : > { %p2310_p3 = por %p2309_p12, %p2308_p4 }
  0xb4   : > { %p2306_p13 = pneg %p2305_p1 }
  0xb5   : > { %p2312_p0 = por %p2311_p9, %p2310_p3 }
  0xb7   : > { %p2313_p2 = pnand %p2312_p0, %p2306_p13 }
  0xb9   : > { %2316 = shalt.err (!%p2313_p2)
}
  0xba   : > { %s2317_s8 = scalar_lea.vmem %s422_s10, 128  ;;  %s2503_s16 = smov [#allocation2]  }
  0xbb   : > { %p2318_p10 = scmp.ne.s32.totalorder %s422_s10, %s2317_s8  ;;  %s2322_s26 = sshll.u32 %s2503_s16, 4  ;;  %s2323_s26 = int_to_ptr.vmem [resolvable:$false] %s2322_s26 }
  0xbc   : > { %s2324_s24 = scalar_lea.vmem %s2323_s26, 256  ;;  %p2325_p11 = scmp.lt.s32.totalorder %s422_s10, %s2323_s26 }
  0xbd   : > { %p2320_p5 = pnand %p2318_p10, %p2750_p6  ;;  %p2326_p8 = scmp.lt.s32.totalorder %s2324_s24, %s2317_s8 }
  0xbf   : > { %p2321_p7 = pneg %p2320_p5  ;;  %p2327_p1 = por %p2326_p8, %p2325_p11 }
  0xc1   : > { %p2328_p4 = pnand %p2327_p1, %p2321_p7 }
  0xc3   : > { %2331 = shalt.err (!%p2328_p4)
}
  0xc4   : > { %p3169_p12 = scmp.ne.s32.totalorder %s3160_s14, 0  ;;  %s2853_s17 = scalar_lea.hbm %s3105_s2, %s2723_s12 }
  0xc5   : > { %s450_s1 = scalar_lea.vmem [#allocation7], %s2720_s28  ;;  %s2332_s5 = scalar_lea.hbm %s2853_s17, 128 }
  0xc6   : > { %2055 = dma.hbm_to_vmem [thread:$0]  (!%p3169_p12), %s2827_s15, 128, %s422_s10, %s410_s21  }
  0xc7   : > { %s457_s29 = sshll.u32 %s450_s1, 4  ;;  %p2333_p13 = scmp.ne.s32.totalorder %s2853_s17, %s2332_s5  ;;  %s458_s29 = int_to_ptr.vmem [resolvable:$true] %s457_s29 }
  0xc8   : > { %s2337_s15 = scalar_lea.hbm %s3105_s2, 256  ;;  %p2338_p0 = scmp.lt.u32.totalorder %s2853_s17, %s3105_s2 }
  0xc9   : > { %p2335_p3 = pnand %p2333_p13, %p2750_p6  ;;  %p2339_p2 = scmp.lt.u32.totalorder %s2337_s15, %s2332_s5 }
  0xca   : > { %p2341_p5 = scmp.lt.u32.totalorder %s2332_s5, %s2853_s17 }
  0xcb   : > { %p2336_p9 = pneg %p2335_p3  ;;  %p2340_p10 = por %p2339_p2, %p2338_p0 }
  0xcd   : > { %p2342_p7 = por %p2341_p5, %p2340_p10 }
  0xcf   : > { %p2343_p11 = pnand %p2342_p7, %p2336_p9 }
  0xd1   : > { %2346 = shalt.err (!%p2343_p11)
}
  0xd2   : > { %s2347_s8 = scalar_lea.vmem %s458_s29, 128  ;;  %s2504_s16 = smov [#allocation7]  }
  0xd3   : > { %p2348_p8 = scmp.ne.s32.totalorder %s458_s29, %s2347_s8  ;;  %s2352_s26 = sshll.u32 %s2504_s16, 4  ;;  %s2353_s26 = int_to_ptr.vmem [resolvable:$false] %s2352_s26 }
  0xd4   : > { %s2354_s24 = scalar_lea.vmem %s2353_s26, 256  ;;  %p2355_p13 = scmp.lt.s32.totalorder %s458_s29, %s2353_s26 }
  0xd5   : > { %p2350_p1 = pnand %p2348_p8, %p2750_p6  ;;  %p2356_p3 = scmp.lt.s32.totalorder %s2354_s24, %s2347_s8 }
  0xd7   : > { %p2351_p4 = pneg %p2350_p1  ;;  %p2357_p12 = por %p2356_p3, %p2355_p13 }
  0xd9   : > { %p2358_p0 = pnand %p2357_p12, %p2351_p4 }
  0xdb   : > { %2361 = shalt.err (!%p2358_p0)
}
  0xdc   : > { %p3170_p2 = scmp.ne.s32.totalorder %s3160_s14, 0  ;;  %s2878_s1 = scalar_lea.hbm %s3106_s3, %s2723_s12 }
  0xdd   : > { %s468_s5 = scalar_lea.vmem [#allocation8], %s2720_s28  ;;  %s3171_s11 = sand.u32 1, %s2494_s22  }
  0xde   : > { %2061 = dma.hbm_to_vmem [thread:$0]  (!%p3170_p2), %s2853_s17, 128, %s458_s29, %s2744_s4  }
  0xdf   : > { %s476_s13 = sshll.u32 %s468_s5, 4  ;;  %s465_s15 = scalar_lea.sflag [#allocation9], %s3171_s11  ;;  %s477_s13 = int_to_ptr.vmem [resolvable:$true] %s476_s13 }
  0xe0   : > { %s2362_s10 = scalar_lea.hbm %s2878_s1, 128  ;;  %s2367_s29 = scalar_lea.hbm %s3106_s3, 256 }
  0xe1   : > { %p2363_p12 = scmp.ne.s32.totalorder %s2878_s1, %s2362_s10  ;;  %p2368_p5 = scmp.lt.u32.totalorder %s2878_s1, %s3106_s3 }
  0xe2   : > { %p2369_p7 = scmp.lt.u32.totalorder %s2367_s29, %s2362_s10  ;;  %p2371_p8 = scmp.lt.u32.totalorder %s2362_s10, %s2878_s1 }
  0xe3   : > { %p2365_p9 = pnand %p2363_p12, %p2750_p6 }
  0xe4   : > { %p2370_p11 = por %p2369_p7, %p2368_p5 }
  0xe5   : > { %p2366_p10 = pneg %p2365_p9 }
  0xe6   : > { %p2372_p1 = por %p2371_p8, %p2370_p11 }
  0xe8   : > { %p2373_p4 = pnand %p2372_p1, %p2366_p10 }
  0xea   : > { %2376 = shalt.err (!%p2373_p4)
}
  0xeb   : > { %s2377_s28 = scalar_lea.vmem %s477_s13, 128  ;;  %s2505_s8 = smov [#allocation8]  }
  0xec   : > { %p2378_p13 = scmp.ne.s32.totalorder %s477_s13, %s2377_s28  ;;  %s2382_s16 = sshll.u32 %s2505_s8, 4  ;;  %s2383_s16 = int_to_ptr.vmem [resolvable:$false] %s2382_s16 }
  0xed   : > { %s2384_s26 = scalar_lea.vmem %s2383_s16, 256  ;;  %p2385_p12 = scmp.lt.s32.totalorder %s477_s13, %s2383_s16 }
  0xee   : > { %p2380_p3 = pnand %p2378_p13, %p2750_p6  ;;  %p2386_p9 = scmp.lt.s32.totalorder %s2384_s26, %s2377_s28 }
  0xf0   : > { %p2381_p0 = pneg %p2380_p3  ;;  %p2387_p2 = por %p2386_p9, %p2385_p12 }
  0xf2   : > { %p2388_p5 = pnand %p2387_p2, %p2381_p0 }
  0xf4   : > { %2391 = shalt.err (!%p2388_p5)
}
  0xf5   : > { %p3172_p7 = scmp.ne.s32.totalorder %s3160_s14, 0  ;;  %p3173_p10 = scmp.ne.s32.totalorder %s3151_s27, 0 }
  0xf6   : > { %s2903_s20 = sand.u32 (!%p3173_p10), 1, %s2478_s18   ;;  %p3174_p6 = scmp.ne.s32.totalorder (!%p3173_p10), %s3148_s25, 0 }
  0xf7   : > { %2064 = dma.hbm_to_vmem [thread:$0]  (!%p3172_p7), %s2878_s1, 128, %s477_s13, %s465_s15  }
  0xf8   : > { %485 = sbr.rel (%p3173_p10) target bundleno = 2492 (0x9bc), region = 64  ;;  %s2906_s24 = sshll.u32 (!%p3173_p10), %s2903_s20, 3 }
  0xf9   : > { %s488_s30 = scalar_lea.sflag (!%p3173_p10), [#allocation3], %s2903_s20  ;;  %s491_s9 = scalar_lea.vmem (!%p3173_p10), [#allocation2], %s2906_s24 }
  0xff   : > { %2445 = dma.done.wait (%p3174_p6), %s488_s30, 128  }
 0x100   : > { %2447 = vsyncadd (%p3174_p6), %s488_s30, 4294967168  ;;  %s496_s27 = sand.u32 1, %s2607_s23   ;;  %s500_s1 = scalar_lea.vmem [#allocation5], %s2906_s24 }
 0x101   : > { %s497_s14 = scalar_lea.sflag [#allocation6], %s496_s27 }
 0x102   : > { %2449 = dma.done.wait (%p3174_p6), %s497_s14, 256  }
 0x103   : > { %2451 = vsyncadd (%p3174_p6), %s497_s14, 4294967040  ;;  %s509_s5 = scalar_lea.vmem [#allocation7], %s2906_s24  ;;  %s515_s13 = scalar_lea.sflag [#allocation9], %s496_s27 }
 0x104   : > { %s518_s11 = scalar_lea.vmem [#allocation8], %s2906_s24 }
 0x105   : > { %2453 = dma.done.wait (%p3174_p6), %s515_s13, 128  }
 0x106   : > { %2455 = vsyncadd (%p3174_p6), %s515_s13, 4294967168  ;;  %p3175_p2 = scmp.eq.s32.totalorder %s2607_s23, 0 }
 0x108   : > { %2457 = dma.done.wait (%p3175_p2), [#allocation9], 512   ;;  %p3176_p11 = pmov %p3175_p2 }
 0x109   : > { %p3177_p8 = pmov %p3175_p2 }
 0x10a   : > { %2459 = vsyncadd (%p3176_p11), [#allocation9], 4294966784 }
 0x10b   : > { %2461 = dma.done.wait (%p3177_p8), [#allocation12], 1024   ;;  %p3178_p1 = pmov %p3175_p2 }
 0x10d   : > { %2463 = vsyncadd (%p3178_p1), [#allocation12], 4294966272  ;;  %p3179_p4 = pmov %p3178_p1 }
 0x10e   : > { %p3180_p13 = pmov %p3178_p1 }
 0x10f   : > { %2465 = dma.done.wait (%p3179_p4), [#allocation15], 512  }
 0x110   : > { %2467 = vsyncadd (%p3180_p13), [#allocation15], 4294966784  ;;  %v2506_v0 = vmov 0.0|0.0   ;;  %vm2507_vm0 = vmmov 0   ;;  %v2508_v1 = vmov 0.0   ;;  %v671_v2 = vld [vmem:[#allocation11] sm:$0xff] }
 0x111   : > { %1995 = vmatprep.subr.bf16.mxu1 %v2506_v0  ;;  %1989 = vmatprep.subr.bf16.mxu0 %v2506_v0  ;;  %v672_v3 = vld [vmem:[#allocation11 + $0x8] sm:$0xff]  ;;  %v592_v4 = vld [vmem:[#allocation10] sm:$0xff]  ;;  %v673_v7 = vld [vmem:[#allocation11 + $0x10] sm:$0xff]  ;;  %vm596_vm1 = vcmask 261120   ;;  %vm826_vm2 = vcmask 64512   ;;  %s2509_s23 = smov 120  }
 0x112   : > { %1924 = vmatprep.mubr.msk.f32.mxu1 %vm2507_vm0, %v2508_v1  ;;  %1913 = vmatprep.mubr.msk.f32.mxu0 %vm2507_vm0, %v2508_v1  ;;  %v1996_v5 = vpack.c.bf16 %v672_v3, %v671_v2  ;;  %v593_v6 = vld [vmem:[#allocation10 + $0x8] sm:$0xff]  ;;  %v674_v8 = vld [vmem:[#allocation11 + $0x18] sm:$0xff]  ;;  %v594_v10 = vld [vmem:[#allocation10 + $0x10] sm:$0xff]  ;;  %s2510_s25 = smov 112   ;;  %s2511_s15 = smov 104   ;;  %vm1500_vm4 = vcmask 130048  }
 0x113   : > { %v1990_v9 = vpack.c.bf16 %v593_v6, %v592_v4  ;;  %v595_v11 = vld [vmem:[#allocation10 + $0x18] sm:$0xff]  ;;  %v1999_v12 = vpack.c.bf16 %v674_v8, %v673_v7  ;;  %v2950_v15 = vld [vmem:[%s491_s9] sm:$0xff]  ;;  %v750_v23 = vld [vmem:[#allocation13 + $0x10] sm:$0xff]  ;;  %s2512_s10 = smov 8   ;;  %s2513_s4 = smov 16   ;;  %vm1502_vm5 = vcmask 195584  }
 0x114   : > { %1997 = vmatpush3.bf16.msra.mxu1 %v1996_v5  ;;  %v1993_v13 = vpack.c.bf16 %v595_v11, %v594_v10  ;;  %v589_v14 = vld [vmem:[%s500_s1] sm:$0xff]  ;;  %v748_v21 = vld [vmem:[#allocation13] sm:$0xff]  ;;  %v749_v22 = vld [vmem:[#allocation13 + $0x8] sm:$0xff]  ;;  %s2514_s17 = smov 24   ;;  %s3181_s21 = sld [smem:[#allocation34_spill]] }
 0x115   : > { %1991 = vmatpush3.bf16.msra.mxu0 %v1990_v9  ;;  %1998 = vmatprep.subr.bf16.mxu1 %v2506_v0  ;;  %v2002_v24 = vpack.c.bf16 %v749_v22, %v748_v21  ;;  %v751_v25 = vld [vmem:[#allocation13 + $0x18] sm:$0xff]  ;;  %v590_v27 = vld [vmem:[%s509_s5] sm:$0xff]  ;;  %s3182_s28 = sld [smem:[#allocation25_spill]]  ;;  %s3183_s8 = sld [smem:[#allocation29_spill]] }
 0x116   : > { %1992 = vmatprep.subr.bf16.mxu0 %v2506_v0  ;;  %v2005_v26 = vpack.c.bf16 %v751_v25, %v750_v23  ;;  %v591_v28 = vld [vmem:[%s518_s11] sm:$0xff]  ;;  %s3184_s30 = sld [smem:[#allocation35_spill]]  ;;  %s3185_s14 = sld [smem:[#allocation36_spill]] }
 0x117   : > { %vm825_vm3 = vcmp.eq.s32.totalorder %v591_v28, 0  ;;  %s587_s5 = scalar_lea.vmem [#allocation16], %s2906_s24  ;;  %s2515_s24 = smov [#allocation16]  }
 0x118   : > { %2000 = vmatpush3.bf16.msra.mxu1 %v1999_v12  ;;  %s1635_s13 = sshll.u32 %s587_s5, 4  ;;  %s3055_s13 = int_to_ptr.vmem [resolvable:$true] %s1635_s13 }
 0x119   : > { %1994 = vmatpush3.bf16.msra.mxu0 %v1993_v13  ;;  %1938 = vmatprep.subr.mxu1 %v2508_v1 }
 0x11a   : > { %2001 = vmatprep.subr.bf16.mxu0 %v2506_v0 }
 0x11b   : > { %1925 = vmatmul.mubr.msk.f32.vlgmr.msra.gmra.mrb[0].mxu1 %vm596_vm1, %v589_v14  ;;  %s1866_s1 = sshll.u32 %s3182_s28, 7  ;;  %p3187_p0 = scmp.ne.s32.totalorder %s3183_s8, 0 }
 0x11c   : > { %1914 = vmatmul.mubr.msk.f32.vlgmr.msra.gmra.mrb[0].mxu0 %vm596_vm1, %v2950_v15  ;;  %1940 = vmatprep.mubr.msk.f32.mxu1 %vm2507_vm0, %v2508_v1 }
 0x11d   : > { %1935 = vmatprep.mubr.msk.f32.mxu0 %vm2507_vm0, %v2508_v1  ;;  %2003 = vmatpush3.bf16.msra.mxu0 %v2002_v24 }
 0x11e   : > { %2004 = vmatprep.subr.bf16.mxu0 %v2506_v0 }
 0x121   : > { %2006 = vmatpush3.bf16.msra.mxu0 %v2005_v26 }
 0x122   : > { %1958 = vmatprep.subr.mxu0 %v2508_v1 }
 0x124   : > { %1936 = vmatmul.mubr.msk.f32.vlgmr.msra.gmra.mrb[2].mxu0 %vm596_vm1, %v590_v27 }
 0x125   : > { %1960 = vmatprep.mubr.msk.f32.mxu0 %vm2507_vm0, %v2508_v1 }
 0x1ee   : > { %v744_v16 = vpop.f32.mrb[0].mxu1 }
 0x1ef   : > { %990 = vrot.lane.b32.xlu1 %v744_v16, %s2509_s23  ;;  %v666_v17 = vpop.f32.mrb[0].mxu0  ;;  %v1926_v18 = vpop.f32.mrb[1].mxu1  ;;  %1939 = vmatpush3.xpose.msk.msra.mxu1 %vm826_vm2, %v744_v16 }
 0x1f0   : > { %v670_v19 = vmul.f32 0.17677669, %v666_v17  ;;  %v1915_v20 = vpop.f32.mrb[1].mxu0  ;;  %1943 = vmatprep.subr.mxu1 %v2508_v1 }
 0x1f2   : > { %1941 = vmatmul.mubr.msk.f32.vlgmr.msra.gmra.mrb[2].mxu1 %vm826_vm2, %v670_v19 }
 0x1f3   : > { %988 = vrot.lane.b32.xlu1 %v670_v19, %s2509_s23  ;;  %1945 = vmatprep.mubr.msk.f32.mxu1 %vm2507_vm0, %v2508_v1 }
 0x1f7   : > { %1155 = vrot.lane.b32.xlu1 %v670_v19, %s2510_s25  ;;  %v2983_v38 = vpop.f32.mrb[2].mxu0 }
 0x1f8   : > { %v1937_v39 = vpop.f32.mrb[3].mxu0  ;;  %1944 = vmatpush3.msra.mxu1 %v2983_v38 }
 0x1f9   : > { %1948 = vmatprep.subr.mxu1 %v2508_v1 }
 0x1fb   : > { %1323 = vrot.lane.b32.xlu1 %v744_v16, %s2511_s15 }
 0x1ff   : > { %1321 = vrot.lane.b32.xlu1 %v670_v19, %s2511_s15 }
 0x261   : > { %v991_v40 = vpop.permute.xlu1 %990 }
 0x265   : > { %v989_v41 = vpop.permute.xlu1 %988 }
 0x269   : > { %v1156_v42 = vpop.permute.xlu1 %1155 }
 0x26d   : > { %v1324_v45 = vpop.permute.xlu1 %1323 }
 0x271   : > { %v1322_v47 = vpop.permute.xlu1 %1321 }
 0x2c5   : > { %v899_v29 = vpop.f32.mrb[2].mxu1 }
 0x2c6   : > { %v903_v30 = vsel %vm825_vm3, -1e+20, %v899_v29  ;;  %v1942_v31 = vpop.f32.mrb[3].mxu1  ;;  %v1504_v29 = vld [vmem:[#allocation14] sm:$0xff] }
 0x2c7   : > { %v904_v32 = vsel %vm826_vm2, %v903_v30, -inf }
 0x2c8   : > { %905 = vmax.xlane.f32.xlu0 %v904_v32  ;;  %v1506_v32 = vld [vmem:[#allocation14 + $0x10] sm:$0xff] }
 0x355   : > { %v906_v33 = vpop.xlane.xlu0 %905 }
 0x356   : > { %v907_v34 = vsub.f32 %v903_v30, %v906_v33  ;;  %v1505_v30 = vld [vmem:[#allocation14 + $0x8] sm:$0xff]  ;;  %v1507_v33 = vld [vmem:[#allocation14 + $0x18] sm:$0xff] }
 0x357   : > { %v2008_v31 = vpack.c.bf16 %v1505_v30, %v1504_v29 }
 0x358   : > { %v908_v35 = vmul.f32 1.442695, %v907_v34  ;;  %v2011_v34 = vpack.c.bf16 %v1507_v33, %v1506_v32 }
 0x35a   : > { %2142 = vpow2.f32 %v908_v35 }
 0x364   : > { %v2143_v36 = vpop.eup %2142 }
 0x365   : > { %v910_v37 = vsel %vm826_vm2, %v2143_v36, 0.0 }
 0x366   : > { %911 = vadd.xlane.f32.xlu0 %v910_v37 }
 0x37c   : > { %1157 = vrot.lane.b32.xlu0 %v744_v16, %s2510_s25 }
 0x3f3   : > { %v912_v43 = vpop.xlane.xlu0 %911 }
 0x3f4   : > { %2144 = vrcp.f32 %v912_v43 }
 0x3f7   : > { %v1158_v44 = vpop.permute.xlu0 %1157 }
 0x3f8   : > { %1959 = vmatpush3.xpose.msk.msra.mxu0 %vm826_vm2, %v1158_v44 }
 0x3f9   : > { %1968 = vmatprep.subr.mxu0 %v2508_v1 }
 0x3fb   : > { %1961 = vmatmul.mubr.msk.f32.vlgmr.msra.gmra.mrb[4].mxu0 %vm826_vm2, %v1156_v42 }
 0x3fc   : > { %1969 = vmatpush3.xpose.msk.msra.mxu0 %vm826_vm2, %v1324_v45  ;;  %1970 = vmatprep.mubr.msk.f32.mxu0 %vm2507_vm0, %v2508_v1  ;;  %v1861_v45 = vld [vmem:[%s3181_s21] ss:$0 sm:$0xff] }
 0x3fd   : > { %2007 = vmatprep.subr.bf16.mxu0 %v2506_v0 }
 0x3fe   : > { %v2145_v46 = vpop.eup %2144 }
 0x3ff   : > { %v914_v48 = vmul.f32 %v2145_v46, %v2143_v36  ;;  %1971 = vmatmul.mubr.msk.f32.vlgmr.msra.gmra.mrb[6].mxu0 %vm826_vm2, %v1322_v47 }
 0x400   : > { %1986 = vmatprep.mubr.msk.f32.mxu0 %vm2507_vm0, %v2508_v1  ;;  %2009 = vmatpush3.bf16.msra.mxu0 %v2008_v31 }
 0x401   : > { %1946 = vmatmul.mubr.msk.f32.vlgmr.msra.gmra.mrb[4].mxu1 %vm826_vm2, %v914_v48  ;;  %2010 = vmatprep.subr.bf16.mxu0 %v2506_v0 }
 0x402   : > { %1949 = vmatpush3.xpose.msk.msra.mxu1 %vm826_vm2, %v991_v40  ;;  %1950 = vmatprep.mubr.msk.f32.mxu1 %vm2507_vm0, %v2508_v1 }
 0x403   : > { %1953 = vmatprep.subr.mxu1 %v2508_v1 }
 0x404   : > { %2012 = vmatpush3.bf16.msra.mxu0 %v2011_v34 }
 0x405   : > { %1951 = vmatmul.mubr.msk.f32.vlgmr.msra.gmra.mrb[6].mxu1 %vm826_vm2, %v989_v41 }
 0x406   : > { %1955 = vmatprep.mubr.msk.f32.mxu1 %vm2507_vm0, %v2508_v1 }
 0x4ce   : > { %v1229_v49 = vpop.f32.mrb[4].mxu0 }
 0x4cf   : > { %v1233_v50 = vsel %vm825_vm3, -1e+20, %v1229_v49  ;;  %v1962_v51 = vpop.f32.mrb[5].mxu0 }
 0x4d0   : > { %v1234_v52 = vsel %vm826_vm2, %v1233_v50, -inf }
 0x4d1   : > { %1235 = vmax.xlane.f32.xlu0 %v1234_v52 }
 0x4d2   : > { %v1395_v53 = vpop.f32.mrb[6].mxu0 }
 0x4d3   : > { %v1972_v54 = vpop.f32.mrb[7].mxu0  ;;  %v1399_v61 = vsel %vm825_vm3, -1e+20, %v1395_v53 }
 0x4d4   : > { %v3008_v55 = vpop.f32.mrb[4].mxu1  ;;  %v1400_v62 = vsel %vm826_vm2, %v1399_v61, -inf }
 0x4d5   : > { %v1947_v56 = vpop.f32.mrb[5].mxu1 }
 0x4d8   : > { %v1062_v57 = vpop.f32.mrb[6].mxu1 }
 0x4d9   : > { %v1066_v58 = vsel %vm825_vm3, -1e+20, %v1062_v57  ;;  %v1952_v59 = vpop.f32.mrb[7].mxu1 }
 0x4da   : > { %v1067_v60 = vsel %vm826_vm2, %v1066_v58, -inf }
 0x4db   : > { %1068 = vmax.xlane.f32.xlu1 %v1067_v60 }
 0x4df   : > { %1401 = vmax.xlane.f32.xlu1 %v1400_v62 }
 0x55e   : > { %v1236_v63 = vpop.xlane.xlu0 %1235 }
 0x55f   : > { %v1237_v2 = vsub.f32 %v1233_v50, %v1236_v63 }
 0x561   : > { %v1238_v3 = vmul.f32 1.442695, %v1237_v2 }
 0x563   : > { %2146 = vpow2.f32 %v1238_v3 }
 0x568   : > { %v1069_v4 = vpop.xlane.xlu1 %1068 }
 0x569   : > { %v1070_v12 = vsub.f32 %v1066_v58, %v1069_v4 }
 0x56b   : > { %v1071_v13 = vmul.f32 1.442695, %v1070_v12 }
 0x56c   : > { %v1402_v5 = vpop.xlane.xlu1 %1401 }
 0x56d   : > { %v2147_v6 = vpop.eup %2146  ;;  %v1403_v7 = vsub.f32 %v1399_v61, %v1402_v5  ;;  %v1864_v61 = vld [vmem:[%s3185_s14] ss:$0 sm:$0xff] }
 0x56e   : > { %v1240_v8 = vsel %vm826_vm2, %v2147_v6, 0.0 }
 0x56f   : > { %v1404_v9 = vmul.f32 1.442695, %v1403_v7  ;;  %1241 = vadd.xlane.f32.xlu0 %v1240_v8 }
 0x571   : > { %2148 = vpow2.f32 %v1404_v9 }
 0x572   : > { %2150 = vpow2.f32 %v1071_v13 }
 0x57b   : > { %v2149_v10 = vpop.eup %2148 }
 0x57c   : > { %v1406_v11 = vsel %vm826_vm2, %v2149_v10, 0.0  ;;  %v2151_v14 = vpop.eup %2150 }
 0x57d   : > { %1407 = vadd.xlane.f32.xlu1 %v1406_v11  ;;  %v1073_v16 = vsel %vm826_vm2, %v2151_v14, 0.0 }
 0x585   : > { %1079 = vrot.lane.b32.xlu0 %v2983_v38, %s2509_s23 }
 0x58e   : > { %1245 = vrot.lane.b32.xlu1 %v2983_v38, %s2510_s25  ;;  %s3186_s25 = sld [smem:[#allocation37_spill]] }
 0x5b2   : > { %1074 = vadd.xlane.f32.xlu1 %v1073_v16 }
 0x5c3   : > { %1411 = vrot.lane.b32.xlu1 %v2983_v38, %s2511_s15  ;;  %s3053_s15 = scalar_lea.hbm %s3186_s25, %s1866_s1 }
 0x5fc   : > { %v1242_v17 = vpop.xlane.xlu0 %1241 }
 0x600   : > { %v1080_v18 = vpop.permute.xlu0 %1079 }
 0x601   : > { %1954 = vmatpush3.msra.mxu1 %v1080_v18 }
 0x602   : > { %1963 = vmatprep.subr.mxu1 %v2508_v1 }
 0x60a   : > { %v1408_v19 = vpop.xlane.xlu1 %1407 }
 0x60e   : > { %v1246_v20 = vpop.permute.xlu1 %1245 }
 0x63f   : > { %v1075_v21 = vpop.xlane.xlu1 %1074 }
 0x640   : > { %2152 = vrcp.f32 %v1075_v21 }
 0x641   : > { %2154 = vrcp.f32 %v1242_v17 }
 0x642   : > { %2156 = vrcp.f32 %v1408_v19 }
 0x643   : > { %v1412_v27 = vpop.permute.xlu1 %1411 }
 0x64a   : > { %v2153_v22 = vpop.eup %2152 }
 0x64b   : > { %v1077_v23 = vmul.f32 %v2153_v22, %v2151_v14  ;;  %v2155_v24 = vpop.eup %2154 }
 0x64c   : > { %v1244_v25 = vmul.f32 %v2155_v24, %v2147_v6  ;;  %v2157_v26 = vpop.eup %2156 }
 0x64d   : > { %1956 = vmatmul.mubr.msk.f32.vlgmr.msra.gmra.mrb[8].mxu1 %vm826_vm2, %v1077_v23  ;;  %v1410_v28 = vmul.f32 %v2157_v26, %v2149_v10 }
 0x64e   : > { %1964 = vmatpush3.msra.mxu1 %v1246_v20  ;;  %1965 = vmatprep.mubr.msk.f32.mxu1 %vm2507_vm0, %v2508_v1 }
 0x64f   : > { %1973 = vmatprep.subr.mxu1 %v2508_v1 }
 0x651   : > { %1966 = vmatmul.mubr.msk.f32.vlgmr.msra.gmra.mrb[10].mxu1 %vm826_vm2, %v1244_v25 }
 0x652   : > { %1974 = vmatpush3.msra.mxu1 %v1412_v27  ;;  %1975 = vmatprep.mubr.msk.f32.mxu1 %vm2507_vm0, %v2508_v1 }
 0x655   : > { %1976 = vmatmul.mubr.msk.f32.vlgmr.msra.gmra.mrb[12].mxu1 %vm826_vm2, %v1410_v28 }
 0x720   : > { %v1151_v35 = vpop.f32.mrb[8].mxu1 }
 0x721   : > { %1488 = vrot.lane.b32.xlu0 %v1151_v35, %s2512_s10  ;;  %v1957_v36 = vpop.f32.mrb[9].mxu1  ;;  %s1621_s10 = scalar_lea.sflag [#allocation4], %s2903_s20 }
 0x724   : > { %v1317_v37 = vpop.f32.mrb[10].mxu1 }
 0x725   : > { %1492 = vrot.lane.b32.xlu1 %v1317_v37, %s2513_s4  ;;  %v1967_v1 = vpop.f32.mrb[11].mxu1  ;;  %s2392_s4 = scalar_lea.vmem %s3055_s13, 128 }
 0x726   : > { %p2393_p3 = scmp.ne.s32.totalorder %s3055_s13, %s2392_s4 }
 0x728   : > { %v1483_v38 = vpop.f32.mrb[12].mxu1  ;;  %p2394_p12 = pnand %p2393_p3, %p3187_p0 }
 0x729   : > { %1496 = vrot.lane.b32.xlu0 %v1483_v38, %s2514_s17  ;;  %v1977_v39 = vpop.f32.mrb[13].mxu1  ;;  %s2396_s17 = sshll.u32 %s2515_s24, 4  ;;  %s2397_s17 = int_to_ptr.vmem [resolvable:$false] %s2396_s17 }
 0x72a   : > { %p2395_p9 = pneg %p2394_p12  ;;  %s2398_s29 = scalar_lea.vmem %s2397_s17, 256 }
 0x72b   : > { %p2399_p5 = scmp.lt.s32.totalorder %s3055_s13, %s2397_s17  ;;  %p2400_p7 = scmp.lt.s32.totalorder %s2398_s29, %s2392_s4 }
 0x72d   : > { %p2401_p10 = por %p2400_p7, %p2399_p5 }
 0x72f   : > { %p2402_p6 = pnand %p2401_p10, %p2395_p9 }
 0x793   : > { %v1489_v40 = vpop.permute.xlu0 %1488 }
 0x794   : > { %v1499_v0 = vsel %vm826_vm2, %v3008_v55, %v1489_v40 }
 0x797   : > { %v1493_v41 = vpop.permute.xlu1 %1492 }
 0x798   : > { %v1501_v42 = vsel %vm1500_vm4, %v1499_v0, %v1493_v41 }
 0x79b   : > { %v1497_v43 = vpop.permute.xlu0 %1496 }
 0x79c   : > { %v1503_v44 = vsel %vm1502_vm5, %v1501_v42, %v1497_v43 }
 0x79d   : > { %1987 = vmatmul.mubr.msk.f32.vlgmr.msra.gmra.mrb[8].mxu0 %vm596_vm1, %v1503_v44 }
 0x870   : > { %v1584_v46 = vpop.f32.mrb[8].mxu0 }
 0x871   : > { %v1585_v47 = vadd.f32 %v1861_v45, %v1584_v46  ;;  %v1988_v48 = vpop.f32.mrb[9].mxu0 }
 0x873   : > { %v1588_v49 = vadd.f32 %v1585_v47, %v2950_v15  ;;  %v1863_v15 = vld [vmem:[%s3184_s30] ss:$0 sm:$0xff] }
 0x875   : > { %v1589_v50 = vsel %vm596_vm1, %v1588_v49, 0.0 }
 0x876   : > { %1590 = vadd.xlane.f32.xlu1 %v1589_v50 }
 0x903   : > { %v1591_v51 = vpop.xlane.xlu1 %1590 }
 0x904   : > { %v1593_v52 = vmul.f32 0.03125, %v1591_v51 }
 0x906   : > { %v1594_v53 = vsub.f32 %v1588_v49, %v1593_v52 }
 0x908   : > { %v1595_v54 = vmul.f32 %v1594_v53, %v1594_v53 }
 0x90a   : > { %v1596_v55 = vsel %vm596_vm1, %v1595_v54, 0.0 }
 0x90b   : > { %1597 = vadd.xlane.f32.xlu0 %v1596_v55 }
 0x998   : > { %v1598_v56 = vpop.xlane.xlu0 %1597 }
 0x999   : > { %v1599_v57 = vmul.f32 0.03125, %v1598_v56 }
 0x99b   : > { %v1600_v58 = vadd.f32 1e-05, %v1599_v57 }
 0x99d   : > { %2158 = vrsqrt.f32 %v1600_v58 }
 0x9a7   : > { %v2159_v59 = vpop.eup %2158 }
 0x9a8   : > { %v1602_v60 = vmul.f32 %v2159_v59, %v1594_v53 }
 0x9aa   : > { %v1610_v62 = vmul.f32 %v1863_v15, %v1602_v60 }
 0x9ac   : > { %v1618_v63 = vadd.f32 %v1864_v61, %v1610_v62 }
 0x9ae   : > { %1619 = vst.msk [vmem:[%s587_s5] sm:$0xff] %vm596_vm1, %v1618_v63 }
 0x9af   : > { %2405 = shalt.err (!%p2402_p6)
}
 0x9b0   : > { %s2406_s20 = scalar_lea.hbm %s3053_s15, 128  ;;  %s2410_s28 = scalar_lea.hbm %s3186_s25, 256 }
 0x9b1   : > { %p2407_p2 = scmp.ne.s32.totalorder %s3053_s15, %s2406_s20  ;;  %p2411_p1 = scmp.lt.u32.totalorder %s3053_s15, %s3186_s25 }
 0x9b2   : > { %p2412_p4 = scmp.lt.u32.totalorder %s2410_s28, %s2406_s20  ;;  %p2414_p3 = scmp.lt.u32.totalorder %s2406_s20, %s3053_s15 }
 0x9b3   : > { %p2408_p11 = pnand %p2407_p2, %p3187_p0 }
 0x9b4   : > { %p2413_p13 = por %p2412_p4, %p2411_p1 }
 0x9b5   : > { %p2409_p8 = pneg %p2408_p11 }
 0x9b6   : > { %p2415_p12 = por %p2414_p3, %p2413_p13 }
 0x9b8   : > { %p2416_p9 = pnand %p2415_p12, %p2409_p8 }
 0x9ba   : > { %2419 = shalt.err (!%p2416_p9)
}
 0x9bb   : > { %2037 = dma.vmem_to_hbm [thread:$0]  (%p3187_p0), %s3055_s13, 128, %s3053_s15, %s1621_s10  }
 0x9bc PF: > { %s3188_s30 = sld [smem:[#allocation24_spill]]  ;;  %s3189_s9 = sld [smem:[#allocation27_spill]] }
 0x9bd   : > { %p3191_p7 = scmp.ge.s32.totalorder %s2494_s22, 2 }
 0x9c2   : > { %s1647_s27 = sand.u32 1, %s3188_s30   ;;  %p3190_p5 = scmp.ne.s32.totalorder %s3189_s9, 0 }
 0x9c3   : > { %s1648_s14 = scalar_lea.sflag [#allocation4], %s1647_s27 }
 0x9c4   : > { %p2066_p10 = pnand %p3191_p7, %p3190_p5 }
 0x9c6   : > { %2469 = dma.done.wait (!%p2066_p10), %s1648_s14, 128  }
 0x9c7   : > { %2471 = vsyncadd (!%p2066_p10), %s1648_s14, 4294967168  ;;  %s35_s22 = sadd.s32 1, %s2494_s22   ;;  %s3192_s8 = sld [smem:[#allocation30_spill]] }
 0x9c8   : > { %p32_p6 = scmp.ge.s32.totalorder %s35_s22, 4   ;;  %s3193_s20 = sld [smem:[#allocation26_spill]] }
 0x9c9   : > { %s3194_s21 = sld [smem:[#allocation28_spill]]  ;;  %s3195_s17 = smov %s2478_s18 }
 0x9ca   : > { %s3196_s18 = smov %s2482_s19  ;;  %34 = sbr.rel (!%p32_p6) target bundleno = 20 (0x14), region = 162 }
 0x9cd   : > { %s3197_s19 = smov %s3192_s8 }
 0x9d1   :  { %1653 = vsyncpa [#allocation3], 1 }
 0x9d2   :  { %1655 = vsyncpa [#allocation3 + $0x1], 1 }
 0x9d3   :  { %1656 = vsyncpa [#allocation6], 1 }
 0x9d4   :  { %1658 = vsyncpa [#allocation6 + $0x1], 1 }
 0x9d5   :  { %1659 = vsyncpa [#allocation9], 1 }
 0x9d6   :  { %1661 = vsyncpa [#allocation9 + $0x1], 1 }
 0x9d7   :  { %1662 = vsyncpa [#allocation12], 1 }
 0x9d8   :  { %1663 = vsyncpa [#allocation15], 1 }
 0x9d9   :  { %1664 = vsyncpa [#allocation4], 1 }
 0x9da   :  { %1666 = vsyncpa [#allocation4 + $0x1], 1 }

</bundles_post_ra>
